<compile_context>
chip_gen: v6e
topology: v6e:2x2x1
jax: 0.10.0
libtpu: 0.0.40
codegen_flags: <defaults>
</compile_context>

<pallas_src>
import jax
import jax.numpy as jnp
from jax.experimental import pallas as pl
from jax.experimental.pallas import tpu as pltpu


def _round_up(x, m):
    return ((x + m - 1) // m) * m


def _mlp_softmax_kernel(x_ref, w1_ref, b1_ref, w2_ref, b2_ref,
                        w3_ref, b3_ref, w4_ref, b4_ref, o_ref):
    """Fused 4-layer MLP (ReLU x3) + softmax, feature-major (features x batch)."""
    x = x_ref[...]                                       # (4, TB), batch on lanes

    # ---- Layer 1: 4 -> 64 (MXU). K=4 padding is cheap; VALU is the scarce slot.
    h = jnp.dot(w1_ref[...], x, preferred_element_type=jnp.float32) + b1_ref[...]
    h = jnp.maximum(h, 0.0)                              # (64, TB)

    # ---- Layer 2: 64 -> 32 (MXU).
    h = jnp.dot(w2_ref[...], h, preferred_element_type=jnp.float32) + b2_ref[...]
    h = jnp.maximum(h, 0.0)                              # (32, TB)

    # ---- Layer 3: 32 -> 16 (MXU).
    h = jnp.dot(w3_ref[...], h, preferred_element_type=jnp.float32) + b3_ref[...]
    h = jnp.maximum(h, 0.0)                              # (16, TB)

    # ---- Layer 4: 16 -> 3 (MXU).
    logits = (jnp.dot(w4_ref[...], h, preferred_element_type=jnp.float32)
              + b4_ref[...])                             # (3, TB)

    # ---- Softmax over the class axis (axis 0 in feature-major layout).
    # Exact divide so every column sums to 1 to f32 accuracy (the approximate
    # EUP reciprocal was the cause of the previous correctness failure).
    m = jnp.max(logits, axis=0, keepdims=True)
    e = jnp.exp(logits - m)
    o_ref[...] = e / jnp.sum(e, axis=0, keepdims=True)


def drought_predict_forward_fm(xT, params, *, max_tile_b=8192):
    """Feature-major forward: xT (4, B) float32 -> (3, B) softmax probabilities.

    No host-side transposes; preferred entry point when the caller already has
    feature-major data.
    """
    w1, b1, w2, b2, w3, b3, w4, b4 = params
    xT = xT.astype(jnp.float32)
    B = xT.shape[1]

    # Pad the batch only up to a multiple of 128 (lane alignment); the grid
    # uses cdiv so the last block may be ragged instead of padding up to TB.
    B_pad = _round_up(max(B, 1), 128)
    if B_pad != B:
        xT = jnp.zeros((4, B_pad), jnp.float32).at[:, :B].set(xT)

    # Batch tile: biggest that comfortably fits VMEM (temporaries ~4 MiB at
    # TB=8192). Keep >= 2 grid steps when there is enough work so v7x's two
    # TensorCores both get a share of the "parallel" batch axis.
    TB = min(max_tile_b, B_pad)
    if B_pad >= 2 * 128 and B_pad // TB < 2:
        TB = _round_up(pl.cdiv(B_pad, 2), 128)
    grid = (pl.cdiv(B_pad, TB),)

    const = lambda i: (0, 0)  # weights/biases stay resident across grid steps

    out_T = pl.pallas_call(
        _mlp_softmax_kernel,
        out_shape=jax.ShapeDtypeStruct((3, B_pad), jnp.float32),
        grid=grid,
        in_specs=[
            pl.BlockSpec((4, TB), lambda i: (0, i)),    # x^T tile (pipelined)
            pl.BlockSpec((64, 4), const),               # W1
            pl.BlockSpec((64, 1), const),               # b1
            pl.BlockSpec((32, 64), const),              # W2
            pl.BlockSpec((32, 1), const),               # b2
            pl.BlockSpec((16, 32), const),              # W3
            pl.BlockSpec((16, 1), const),               # b3
            pl.BlockSpec((3, 16), const),               # W4
            pl.BlockSpec((3, 1), const),                # b4
        ],
        out_specs=pl.BlockSpec((3, TB), lambda i: (0, i)),
        compiler_params=pltpu.CompilerParams(
            dimension_semantics=("parallel",)),         # shard batch over TCs
    )(xT, w1, b1, w2, b2, w3, b3, w4, b4)

    return out_T[:, :B]


def drought_predict_forward(x, params, *, max_tile_b=8192):
    """Row-major (PyTorch-style) API: x (B, 4) -> (B, 3)."""
    out_T = drought_predict_forward_fm(x.astype(jnp.float32).T, params,
                                       max_tile_b=max_tile_b)
    return out_T.T


def init_params(key):
    """Synthetic params matching nn.Linear(4,64),(64,32),(32,16),(16,3).

    Weights in PyTorch's native (out_features, in_features) layout, biases as
    (out_features, 1) for the feature-major kernel.
    """
    dims = [(4, 64), (64, 32), (32, 16), (16, 3)]
    params = []
    for i, (fan_in, fan_out) in enumerate(dims):
        kw, kb = jax.random.split(jax.random.fold_in(key, i))
        bound = 1.0 / (fan_in ** 0.5)
        w = jax.random.uniform(kw, (fan_out, fan_in), jnp.float32, -bound, bound)
        b = jax.random.uniform(kb, (fan_out, 1), jnp.float32, -bound, bound)
        params += [w, b]
    return tuple(params)


def reference_forward(x, params):
    """Pure-JAX reference of the same forward pass (row-major, like PyTorch)."""
    w1, b1, w2, b2, w3, b3, w4, b4 = params
    h = jax.nn.relu(x @ w1.T + b1.T)
    h = jax.nn.relu(h @ w2.T + b2.T)
    h = jax.nn.relu(h @ w3.T + b3.T)
    return jax.nn.softmax(h @ w4.T + b4.T, axis=1)


if __name__ == "__main__":
    key = jax.random.PRNGKey(0)
    params = init_params(key)

    # -- small batch: single 128-wide tile, single grid step ------------------
    x_small = jax.random.normal(jax.random.fold_in(key, 100), (8, 4), jnp.float32)
    out_small = jax.block_until_ready(drought_predict_forward(x_small, params))
    assert out_small.shape == (8, 3)
    assert bool(jnp.allclose(jnp.sum(out_small, axis=1), 1.0, atol=1e-3))
    ref_small = reference_forward(x_small, params)
    assert bool(jnp.allclose(out_small, ref_small, atol=3e-3, rtol=3e-3))

    # -- larger batch: pads only to 1664 (multiple of 128), 2-step grid with a
    #    ragged last block; exercises resident weights + partial output writes.
    x_large = jax.random.normal(jax.random.fold_in(key, 200), (1537, 4), jnp.float32)
    out_large = jax.block_until_ready(drought_predict_forward(x_large, params))
    assert out_large.shape == (1537, 3)
    assert bool(jnp.allclose(jnp.sum(out_large, axis=1), 1.0, atol=1e-3))
    ref_large = reference_forward(x_large, params)
    assert bool(jnp.allclose(out_large, ref_large, atol=3e-3, rtol=3e-3))

    print("KERNEL_OK")
</pallas_src>

<mosaic_0001>
module attributes {stable_mosaic.version = 11 : i64} {
  func.func @_mlp_softmax_kernel(%arg0: i32, %arg1: memref<4x128xf32, #tpu.memory_space<vmem>>, %arg2: memref<64x4xf32, #tpu.memory_space<vmem>>, %arg3: memref<64x1xf32, #tpu.memory_space<vmem>>, %arg4: memref<32x64xf32, #tpu.memory_space<vmem>>, %arg5: memref<32x1xf32, #tpu.memory_space<vmem>>, %arg6: memref<16x32xf32, #tpu.memory_space<vmem>>, %arg7: memref<16x1xf32, #tpu.memory_space<vmem>>, %arg8: memref<3x16xf32, #tpu.memory_space<vmem>>, %arg9: memref<3x1xf32, #tpu.memory_space<vmem>>, %arg10: memref<3x128xf32, #tpu.memory_space<vmem>>) attributes {dimension_semantics = [#tpu.dimension_semantics<parallel>], iteration_bounds = array<i64: 1>, scalar_prefetch = 0 : i64, scratch_operands = 0 : i64, tpu.core_type = #tpu.core_type<tc>, window_params = [{transform_indices = @transform_0, window_bounds = array<i64: 4, 128>}, {pipeline_mode = #tpu.pipeline_mode<synchronous>, transform_indices = @transform_1, window_bounds = array<i64: 64, 4>}, {pipeline_mode = #tpu.pipeline_mode<synchronous>, transform_indices = @transform_2, window_bounds = array<i64: 64, 1>}, {pipeline_mode = #tpu.pipeline_mode<synchronous>, transform_indices = @transform_3, window_bounds = array<i64: 32, 64>}, {pipeline_mode = #tpu.pipeline_mode<synchronous>, transform_indices = @transform_4, window_bounds = array<i64: 32, 1>}, {pipeline_mode = #tpu.pipeline_mode<synchronous>, transform_indices = @transform_5, window_bounds = array<i64: 16, 32>}, {pipeline_mode = #tpu.pipeline_mode<synchronous>, transform_indices = @transform_6, window_bounds = array<i64: 16, 1>}, {pipeline_mode = #tpu.pipeline_mode<synchronous>, transform_indices = @transform_7, window_bounds = array<i64: 3, 16>}, {pipeline_mode = #tpu.pipeline_mode<synchronous>, transform_indices = @transform_8, window_bounds = array<i64: 3, 1>}, {transform_indices = @transform_9, window_bounds = array<i64: 3, 128>}]} {
    %c0 = arith.constant 0 : index
    %c0_0 = arith.constant 0 : index
    %0 = vector.load %arg1[%c0, %c0_0] : memref<4x128xf32, #tpu.memory_space<vmem>>, vector<4x128xf32>
    %c0_1 = arith.constant 0 : index
    %c0_2 = arith.constant 0 : index
    %1 = vector.load %arg2[%c0_1, %c0_2] : memref<64x4xf32, #tpu.memory_space<vmem>>, vector<64x4xf32>
    %cst = arith.constant dense<0.000000e+00> : vector<64x128xf32>
    %2 = tpu.matmul %1, %0, %cst {dimension_numbers = #tpu.dot_dimension_numbers<[1], [0], [0], [1], [0, 0, 1, 1], [], []>} : vector<64x4xf32>, vector<4x128xf32>, vector<64x128xf32> -> vector<64x128xf32>
    %c0_3 = arith.constant 0 : index
    %c0_4 = arith.constant 0 : index
    %3 = vector.load %arg3[%c0_3, %c0_4] : memref<64x1xf32, #tpu.memory_space<vmem>>, vector<64x1xf32>
    %4 = vector.broadcast %3 : vector<64x1xf32> to vector<64x128xf32>
    %5 = arith.addf %2, %4 : vector<64x128xf32>
    %cst_5 = arith.constant 0.000000e+00 : f32
    %6 = vector.broadcast %cst_5 : f32 to vector<64x128xf32>
    %7 = arith.maximumf %5, %6 : vector<64x128xf32>
    %c0_6 = arith.constant 0 : index
    %c0_7 = arith.constant 0 : index
    %8 = vector.load %arg4[%c0_6, %c0_7] : memref<32x64xf32, #tpu.memory_space<vmem>>, vector<32x64xf32>
    %cst_8 = arith.constant dense<0.000000e+00> : vector<32x128xf32>
    %9 = tpu.matmul %8, %7, %cst_8 {dimension_numbers = #tpu.dot_dimension_numbers<[1], [0], [0], [1], [0, 0, 1, 1], [], []>} : vector<32x64xf32>, vector<64x128xf32>, vector<32x128xf32> -> vector<32x128xf32>
    %c0_9 = arith.constant 0 : index
    %c0_10 = arith.constant 0 : index
    %10 = vector.load %arg5[%c0_9, %c0_10] : memref<32x1xf32, #tpu.memory_space<vmem>>, vector<32x1xf32>
    %11 = vector.broadcast %10 : vector<32x1xf32> to vector<32x128xf32>
    %12 = arith.addf %9, %11 : vector<32x128xf32>
    %cst_11 = arith.constant 0.000000e+00 : f32
    %13 = vector.broadcast %cst_11 : f32 to vector<32x128xf32>
    %14 = arith.maximumf %12, %13 : vector<32x128xf32>
    %c0_12 = arith.constant 0 : index
    %c0_13 = arith.constant 0 : index
    %15 = vector.load %arg6[%c0_12, %c0_13] : memref<16x32xf32, #tpu.memory_space<vmem>>, vector<16x32xf32>
    %cst_14 = arith.constant dense<0.000000e+00> : vector<16x128xf32>
    %16 = tpu.matmul %15, %14, %cst_14 {dimension_numbers = #tpu.dot_dimension_numbers<[1], [0], [0], [1], [0, 0, 1, 1], [], []>} : vector<16x32xf32>, vector<32x128xf32>, vector<16x128xf32> -> vector<16x128xf32>
    %c0_15 = arith.constant 0 : index
    %c0_16 = arith.constant 0 : index
    %17 = vector.load %arg7[%c0_15, %c0_16] : memref<16x1xf32, #tpu.memory_space<vmem>>, vector<16x1xf32>
    %18 = vector.broadcast %17 : vector<16x1xf32> to vector<16x128xf32>
    %19 = arith.addf %16, %18 : vector<16x128xf32>
    %cst_17 = arith.constant 0.000000e+00 : f32
    %20 = vector.broadcast %cst_17 : f32 to vector<16x128xf32>
    %21 = arith.maximumf %19, %20 : vector<16x128xf32>
    %c0_18 = arith.constant 0 : index
    %c0_19 = arith.constant 0 : index
    %22 = vector.load %arg8[%c0_18, %c0_19] : memref<3x16xf32, #tpu.memory_space<vmem>>, vector<3x16xf32>
    %cst_20 = arith.constant dense<0.000000e+00> : vector<3x128xf32>
    %23 = tpu.matmul %22, %21, %cst_20 {dimension_numbers = #tpu.dot_dimension_numbers<[1], [0], [0], [1], [0, 0, 1, 1], [], []>} : vector<3x16xf32>, vector<16x128xf32>, vector<3x128xf32> -> vector<3x128xf32>
    %c0_21 = arith.constant 0 : index
    %c0_22 = arith.constant 0 : index
    %24 = vector.load %arg9[%c0_21, %c0_22] : memref<3x1xf32, #tpu.memory_space<vmem>>, vector<3x1xf32>
    %25 = vector.broadcast %24 : vector<3x1xf32> to vector<3x128xf32>
    %26 = arith.addf %23, %25 : vector<3x128xf32>
    %cst_23 = arith.constant dense<0xFF800000> : vector<128xf32>
    %27 = vector.multi_reduction <maximumf>, %26, %cst_23 [0] : vector<3x128xf32> to vector<128xf32>
    %28 = vector.shape_cast %27 : vector<128xf32> to vector<1x128xf32>
    %29 = vector.broadcast %28 : vector<1x128xf32> to vector<3x128xf32>
    %30 = arith.subf %26, %29 : vector<3x128xf32>
    %31 = math.exp %30 : vector<3x128xf32>
    %cst_24 = arith.constant dense<0.000000e+00> : vector<128xf32>
    %32 = vector.multi_reduction <add>, %31, %cst_24 [0] : vector<3x128xf32> to vector<128xf32>
    %33 = vector.shape_cast %32 : vector<128xf32> to vector<1x128xf32>
    %34 = vector.broadcast %33 : vector<1x128xf32> to vector<3x128xf32>
    %35 = arith.divf %31, %34 : vector<3x128xf32>
    %c0_25 = arith.constant 0 : index
    %c0_26 = arith.constant 0 : index
    %36 = vector.load %arg10[%c0_25, %c0_26] : memref<3x128xf32, #tpu.memory_space<vmem>>, vector<3x128xf32>
    tpu.vector_store %arg10[%c0_25, %c0_26], %35 {strides = array<i32>} : memref<3x128xf32, #tpu.memory_space<vmem>>, vector<3x128xf32>,
    return
  }
  func.func @transform_0(%arg0: i32) -> (i32, i32) {
    %c0_i32 = arith.constant 0 : i32
    %c0_i32_0 = arith.constant 0 : i32
    return %c0_i32, %arg0 : i32, i32
  }
  func.func @transform_1(%arg0: i32) -> (i32, i32) {
    %c0_i32 = arith.constant 0 : i32
    %c0_i32_0 = arith.constant 0 : i32
    %c0_i32_1 = arith.constant 0 : i32
    return %c0_i32, %c0_i32_0 : i32, i32
  }
  func.func @transform_2(%arg0: i32) -> (i32, i32) {
    %c0_i32 = arith.constant 0 : i32
    %c0_i32_0 = arith.constant 0 : i32
    %c0_i32_1 = arith.constant 0 : i32
    return %c0_i32, %c0_i32_0 : i32, i32
  }
  func.func @transform_3(%arg0: i32) -> (i32, i32) {
    %c0_i32 = arith.constant 0 : i32
    %c0_i32_0 = arith.constant 0 : i32
    %c0_i32_1 = arith.constant 0 : i32
    return %c0_i32, %c0_i32_0 : i32, i32
  }
  func.func @transform_4(%arg0: i32) -> (i32, i32) {
    %c0_i32 = arith.constant 0 : i32
    %c0_i32_0 = arith.constant 0 : i32
    %c0_i32_1 = arith.constant 0 : i32
    return %c0_i32, %c0_i32_0 : i32, i32
  }
  func.func @transform_5(%arg0: i32) -> (i32, i32) {
    %c0_i32 = arith.constant 0 : i32
    %c0_i32_0 = arith.constant 0 : i32
    %c0_i32_1 = arith.constant 0 : i32
    return %c0_i32, %c0_i32_0 : i32, i32
  }
  func.func @transform_6(%arg0: i32) -> (i32, i32) {
    %c0_i32 = arith.constant 0 : i32
    %c0_i32_0 = arith.constant 0 : i32
    %c0_i32_1 = arith.constant 0 : i32
    return %c0_i32, %c0_i32_0 : i32, i32
  }
  func.func @transform_7(%arg0: i32) -> (i32, i32) {
    %c0_i32 = arith.constant 0 : i32
    %c0_i32_0 = arith.constant 0 : i32
    %c0_i32_1 = arith.constant 0 : i32
    return %c0_i32, %c0_i32_0 : i32, i32
  }
  func.func @transform_8(%arg0: i32) -> (i32, i32) {
    %c0_i32 = arith.constant 0 : i32
    %c0_i32_0 = arith.constant 0 : i32
    %c0_i32_1 = arith.constant 0 : i32
    return %c0_i32, %c0_i32_0 : i32, i32
  }
  func.func @transform_9(%arg0: i32) -> (i32, i32) {
    %c0_i32 = arith.constant 0 : i32
    %c0_i32_0 = arith.constant 0 : i32
    return %c0_i32, %arg0 : i32, i32
  }
}

</mosaic_0001>

<bundles_post_ra>
// kernel: tpu_custom_call.1
= control target key start
LH: loop header
LB: loop body
LE: loop exit
PB: predicated region body
PF: predicated region fallthrough
CT: control target
= control target key end

     0   :  { %vm115_vm0 = vcmask 1043456   ;;  %vm90_vm1 = vcmask 31744   ;;  %v708_v4 = vmov 0   ;;  %s872_s0 = inlined_call_operand.vmem [shape: f32[4,128], index: 0, kind: input, shape index: {}]   ;;  %s873_s1 = inlined_call_operand.vmem [shape: f32[64,4], index: 1, kind: input, shape index: {}]   ;;  %s874_s2 = inlined_call_operand.vmem [shape: f32[64,1], index: 2, kind: input, shape index: {}]   ;;  %s875_s3 = inlined_call_operand.vmem [shape: f32[32,64], index: 3, kind: input, shape index: {}]   ;;  %s876_s4 = inlined_call_operand.vmem [shape: f32[32,1], index: 4, kind: input, shape index: {}]   ;;  %s877_s5 = inlined_call_operand.vmem [shape: f32[16,32], index: 5, kind: input, shape index: {}]   ;;  %s878_s6 = inlined_call_operand.vmem [shape: f32[16,1], index: 6, kind: input, shape index: {}]   ;;  %s879_s7 = inlined_call_operand.vmem [shape: f32[3,16], index: 7, kind: input, shape index: {}]   ;;  %s880_s8 = inlined_call_operand.vmem [shape: f32[3,1], index: 8, kind: input, shape index: {}]   ;;  %s881_s9 = inlined_call_operand.hbm [shape: f32[3,128], index: 9, kind: output, shape index: {}]  }
   0x1   :  { %v33_v0 = vld [vmem:[%s872_s0] sm:$0xf]  ;;  %v35_v2 = vld [vmem:[%s873_s1 + $0x8] sm:$0xff]  ;;  %v36_v3 = vld [vmem:[%s873_s1 + $0x10] sm:$0xff]  ;;  %680 = vset.pattern.permute.xlu0 %v708_v4  ;;  %681 = vset.pattern.permute.xlu1 %v708_v4 }
   0x2   :  { %v34_v1 = vld [vmem:[%s873_s1] sm:$0xff]  ;;  %622 = vmatprep.subr.msk.mxu0 %vm115_vm0, %v33_v0  ;;  %v49_v5 = vld [vmem:[%s874_s2 + $0x38] sm:$0xff]  ;;  %v47_v6 = vld [vmem:[%s874_s2 + $0x28] sm:$0xff] }
   0x3   :  { %624 = vmatprep.mubr.msk.f32.mxu0 %vm90_vm1, %v34_v1  ;;  %623 = vmatpush3.msk.msra.mxu0 %vm115_vm0, %v33_v0  ;;  %v37_v7 = vld [vmem:[%s873_s1 + $0x18] sm:$0xff]  ;;  %v38_v8 = vld [vmem:[%s873_s1 + $0x20] sm:$0xff]  ;;  %v48_v9 = vld [vmem:[%s874_s2 + $0x30] sm:$0xff] }
   0x4   :  { %625 = vmatmul.mubr.msk.f32.vlgmr.msra.gmra.mxu0 %vm90_vm1, %v35_v2  ;;  %87 = vperm.xlu0 %680, %v49_v5   ;;  %v46_v10 = vld [vmem:[%s874_s2 + $0x20] sm:$0xff]  ;;  %v39_v11 = vld [vmem:[%s873_s1 + $0x28] sm:$0xff] }
   0x5   :  { %627 = vmatprep.mubr.msk.f32.mxu0 %vm90_vm1, %v36_v3  ;;  %77 = vperm.xlu1 %681, %v47_v6  }
   0x8   :  { %628 = vmatmul.mubr.msk.f32.gmra.mxu0 %vm90_vm1, %v37_v7  ;;  %82 = vperm.xlu0 %680, %v48_v9  }
   0x9   :  { %630 = vmatprep.mubr.msk.f32.mxu0 %vm90_vm1, %v38_v8 }
   0xa   :  { %14 = vsyncpa [#allocation3], 0  ;;  %v40_v12 = vld [vmem:[%s873_s1 + $0x30] sm:$0xff]  ;;  %v45_v13 = vld [vmem:[%s874_s2 + $0x18] sm:$0xff]  ;;  %72 = vperm.xlu1 %681, %v46_v10   ;;  %vm260_vm2 = vcmask 523264   ;;  %vm376_vm3 = vcmask 261120  }
   0xb   :  { %v44_v14 = vld [vmem:[%s874_s2 + $0x10] sm:$0xff]  ;;  %v41_v15 = vld [vmem:[%s873_s1 + $0x38] sm:$0xff]  ;;  %v43_v16 = vld [vmem:[%s874_s2 + $0x8] sm:$0xff]  ;;  %vm710_vm4 = vmmov 0   ;;  %vm467_vm5 = vcmask 130048   ;;  %vm541_vm6 = vcmask 1042432  }
   0xc   :  { %631 = vmatmul.mubr.msk.f32.gmra.mxu0 %vm90_vm1, %v39_v11  ;;  %67 = vperm.xlu0 %680, %v45_v13   ;;  %v42_v17 = vld [vmem:[%s874_s2] sm:$0xff]  ;;  %v239_v18 = vld [vmem:[%s876_s4 + $0x18] sm:$0xff]  ;;  %v238_v19 = vld [vmem:[%s876_s4 + $0x10] sm:$0xff] }
   0xd   :  { %633 = vmatprep.mubr.msk.f32.mxu0 %vm90_vm1, %v40_v12  ;;  %v237_v20 = vld [vmem:[%s876_s4 + $0x8] sm:$0xff]  ;;  %v236_v21 = vld [vmem:[%s876_s4] sm:$0xff]  ;;  %v234_v59 = vld [vmem:[%s875_s3 + $0x10] sm:$0xff] }
   0xe   :  { %62 = vperm.xlu1 %681, %v44_v14   ;;  %v365_v22 = vld [vmem:[%s878_s6 + $0x8] sm:$0xff]  ;;  %v364_v23 = vld [vmem:[%s878_s6] sm:$0xff]  ;;  %v235_v60 = vld [vmem:[%s875_s3 + $0x18] sm:$0xff] }
   0xf   :  { %v461_v24 = vld [vmem:[%s880_s8] sm:$0x7]  ;;  %v233_v58 = vld [vmem:[%s875_s3 + $0x8] sm:$0xff] }
  0x10   :  { %634 = vmatmul.mubr.msk.f32.gmra.mxu0 %vm90_vm1, %v41_v15  ;;  %57 = vperm.xlu0 %680, %v43_v16   ;;  %v232_v25 = vld [vmem:[%s875_s3] sm:$0xff]  ;;  %v363_v14 = vld [vmem:[%s877_s5 + $0x8] sm:$0xff]  ;;  %v709_v15 = vmov 0.0  }
  0x11   :  { %652 = vmatprep.mubr.msk.f32.mxu1 %vm260_vm2, %v232_v25  ;;  %v362_v61 = vld [vmem:[%s877_s5] sm:$0xff]  ;;  %s711_s5 = smov [#allocation2]  }
  0x12   :  { %52 = vperm.xlu1 %681, %v42_v17   ;;  %666 = vmatprep.mubr.msk.f32.mxu0 %vm376_vm3, %v362_v61 }
  0x14   :  { %257 = vperm.xlu0 %680, %v239_v18  }
  0x16   :  { %252 = vperm.xlu1 %681, %v238_v19  }
  0x18   :  { %247 = vperm.xlu0 %680, %v237_v20  }
  0x1a   :  { %242 = vperm.xlu1 %681, %v236_v21  }
  0x1c   :  { %373 = vperm.xlu0 %680, %v365_v22  }
  0x1e   :  { %368 = vperm.xlu1 %681, %v364_v23  }
  0x20   :  { %464 = vperm.xlu0 %680, %v461_v24   ;;  %v460_v24 = vld [vmem:[%s879_s7] sm:$0x7]  ;;  %s568_s7 = sshll.u32 %s711_s5, 4  ;;  %s569_s7 = int_to_ptr.vmem [resolvable:$true] %s568_s7 }
  0x21   :  { %s686_s20 = scalar_lea.vmem %s569_s7, 64  ;;  %p691_p1 = scmp.lt.s32.totalorder %s569_s7, %s569_s7 }
  0x22   :  { %p687_p0 = scmp.ne.s32.totalorder %s569_s7, %s686_s20  ;;  %p692_p2 = scmp.lt.s32.totalorder %s686_s20, %s686_s20 }
  0x24   :  { %p693_p3 = por %p692_p2, %p691_p1 }
  0x26   :  { %p694_p4 = pnand %p693_p3, %p687_p0 }
  0x7f   :  { %v88_v28 = vpop.permute.xlu0 %87 }
  0x80   :  { %v78_v29 = vpop.permute.xlu1 %77 }
  0x83   :  { %v83_v33 = vpop.permute.xlu0 %82 }
  0x85   :  { %v73_v34 = vpop.permute.xlu1 %72 }
  0x87   :  { %v68_v42 = vpop.permute.xlu0 %67 }
  0x89   :  { %v63_v43 = vpop.permute.xlu1 %62 }
  0x8b   :  { %v58_v50 = vpop.permute.xlu0 %57 }
  0x8d   :  { %v53_v51 = vpop.permute.xlu1 %52 }
  0x8f   :  { %v258_v62 = vpop.permute.xlu0 %257 }
  0x91   :  { %v253_v0 = vpop.permute.xlu1 %252 }
  0x93   :  { %v248_v4 = vpop.permute.xlu0 %247 }
  0x95   :  { %v243_v9 = vpop.permute.xlu1 %242 }
  0x97   :  { %v374_v16 = vpop.permute.xlu0 %373 }
  0x99   :  { %v369_v19 = vpop.permute.xlu1 %368 }
  0x9b   :  { %v465_v25 = vpop.permute.xlu0 %464 }
  0xc4   :  { %v626_v26 = vpop.f32.mrf.mxu0 }
  0xc5   :  { %v191_v52 = vadd.f32 %v626_v26, %v58_v50 }
  0xc6   :  { %v185_v27 = vpop.f32.mrf.mxu0 }
  0xc7   :  { %v186_v54 = vadd.f32 %v185_v27, %v53_v51  ;;  %v225_v56 = vmax.f32 %v191_v52, 0.0 }
  0xc8   :  { %v629_v30 = vpop.f32.mrf.mxu0 }
  0xc9   :  { %v201_v46 = vadd.f32 %v629_v30, %v68_v42  ;;  %v224_v57 = vmax.f32 %v186_v54, 0.0 }
  0xca   :  { %v195_v31 = vpop.f32.mrf.mxu0 }
  0xcb   :  { %v196_v48 = vadd.f32 %v195_v31, %v63_v43  ;;  %v227_v53 = vmax.f32 %v201_v46, 0.0 }
  0xcc   :  { %v632_v32 = vpop.f32.mrf.mxu0 }
  0xcd   :  { %v211_v39 = vadd.f32 %v632_v32, %v78_v29  ;;  %v226_v55 = vmax.f32 %v196_v48, 0.0 }
  0xce   :  { %v205_v35 = vpop.f32.mrf.mxu0 }
  0xcf   :  { %v206_v44 = vadd.f32 %v205_v35, %v73_v34  ;;  %v229_v47 = vmax.f32 %v211_v39, 0.0 }
  0xd0   :  { %v635_v36 = vpop.f32.mrf.mxu0 }
  0xd1   :  { %v221_v37 = vadd.f32 %v635_v36, %v88_v28  ;;  %v228_v49 = vmax.f32 %v206_v44, 0.0 }
  0xd2   :  { %v215_v38 = vpop.f32.mrf.mxu0 }
  0xd3   :  { %v231_v40 = vmax.f32 %v221_v37, 0.0  ;;  %v216_v41 = vadd.f32 %v215_v38, %v83_v33 }
  0xd5   :  { %v230_v45 = vmax.f32 %v216_v41, 0.0  ;;  %636 = vmatprep.subr.mxu1 %v231_v40 }
  0xd6   :  { %637 = vmatpush3.msra.mxu1 %v231_v40 }
  0xd7   :  { %638 = vmatprep.subr.mxu1 %v230_v45 }
  0xd8   :  { %639 = vmatpush3.msra.mxu1 %v230_v45 }
  0xd9   :  { %640 = vmatprep.subr.mxu1 %v229_v47 }
  0xda   :  { %641 = vmatpush3.msra.mxu1 %v229_v47 }
  0xdb   :  { %642 = vmatprep.subr.mxu1 %v228_v49 }
  0xdc   :  { %643 = vmatpush3.msra.mxu1 %v228_v49 }
  0xdd   :  { %644 = vmatprep.subr.mxu1 %v227_v53 }
  0xde   :  { %645 = vmatpush3.msra.mxu1 %v227_v53 }
  0xdf   :  { %646 = vmatprep.subr.mxu1 %v226_v55 }
  0xe0   :  { %647 = vmatpush3.msra.mxu1 %v226_v55 }
  0xe1   :  { %648 = vmatprep.subr.mxu1 %v225_v56 }
  0xe2   :  { %649 = vmatpush3.msra.mxu1 %v225_v56 }
  0xe3   :  { %650 = vmatprep.subr.mxu1 %v224_v57 }
  0xe4   :  { %651 = vmatpush3.msra.mxu1 %v224_v57 }
  0xe5   :  { %653 = vmatmul.mubr.msk.f32.vlgmr.msra.gmra.mxu1 %vm260_vm2, %v233_v58 }
  0xe6   :  { %655 = vmatprep.mubr.msk.f32.mxu1 %vm260_vm2, %v234_v59 }
  0xe9   :  { %656 = vmatmul.mubr.msk.f32.gmra.mxu1 %vm260_vm2, %v235_v60 }
 0x1a5   :  { %v654_v63 = vpop.f32.mrf.mxu1 }
 0x1a6   :  { %v345_v6 = vadd.f32 %v654_v63, %v248_v4 }
 0x1a7   :  { %v339_v1 = vpop.f32.mrf.mxu1 }
 0x1a8   :  { %v340_v10 = vadd.f32 %v339_v1, %v243_v9  ;;  %v359_v12 = vmax.f32 %v345_v6, 0.0 }
 0x1a9   :  { %v657_v2 = vpop.f32.mrf.mxu1 }
 0x1aa   :  { %v355_v3 = vadd.f32 %v657_v2, %v258_v62  ;;  %v358_v13 = vmax.f32 %v340_v10, 0.0 }
 0x1ab   :  { %v349_v5 = vpop.f32.mrf.mxu1 }
 0x1ac   :  { %v361_v7 = vmax.f32 %v355_v3, 0.0  ;;  %v350_v8 = vadd.f32 %v349_v5, %v253_v0 }
 0x1ae   :  { %v360_v11 = vmax.f32 %v350_v8, 0.0  ;;  %658 = vmatprep.subr.mxu0 %v361_v7 }
 0x1af   :  { %659 = vmatpush3.msra.mxu0 %v361_v7 }
 0x1b0   :  { %660 = vmatprep.subr.mxu0 %v360_v11 }
 0x1b1   :  { %661 = vmatpush3.msra.mxu0 %v360_v11 }
 0x1b2   :  { %662 = vmatprep.subr.mxu0 %v359_v12 }
 0x1b3   :  { %663 = vmatpush3.msra.mxu0 %v359_v12 }
 0x1b4   :  { %664 = vmatprep.subr.mxu0 %v358_v13 }
 0x1b5   :  { %665 = vmatpush3.msra.mxu0 %v358_v13 }
 0x1b6   :  { %667 = vmatmul.mubr.msk.f32.vlgmr.msra.gmra.mxu0 %vm376_vm3, %v363_v14  ;;  %669 = vmatprep.subr.mxu0 %v709_v15 }
 0x1b7   :  { %673 = vmatprep.mubr.msk.f32.mxu0 %vm710_vm4, %v709_v15 }
 0x276   :  { %v668_v17 = vpop.f32.mrf.mxu0 }
 0x277   :  { %v455_v18 = vadd.f32 %v668_v17, %v374_v16 }
 0x278   :  { %v449_v20 = vpop.f32.mrf.mxu0 }
 0x279   :  { %v459_v21 = vmax.f32 %v455_v18, 0.0  ;;  %v450_v22 = vadd.f32 %v449_v20, %v369_v19 }
 0x27b   :  { %v458_v23 = vmax.f32 %v450_v22, 0.0  ;;  %670 = vmatpush3.msra.mxu0 %v459_v21 }
 0x27c   :  { %671 = vmatprep.subr.mxu0 %v709_v15 }
 0x27d   :  { %672 = vmatpush3.msra.mxu0 %v458_v23 }
 0x27e   :  { %674 = vmatmul.mubr.msk.f32.vlgmr.msra.gmra.mxu0 %vm467_vm5, %v460_v24 }
 0x33e   :  { %v537_v26 = vpop.f32.mrf.mxu0 }
 0x33f   :  { %v538_v27 = vadd.f32 %v537_v26, %v465_v25 }
 0x340   :  { %v675_v28 = vpop.f32.mrf.mxu0 }
 0x341   :  { %v542_v29 = vsel %vm541_vm6, %v538_v27, -inf }
 0x342   :  { %v543_v30 = vrot.slane %v542_v29, 4 }
 0x344   :  { %v544_v31 = vmax.f32 %v542_v29, %v543_v30 }
 0x346   :  { %v545_v32 = vrot.slane %v544_v31, 2 }
 0x348   :  { %v546_v33 = vmax.f32 %v544_v31, %v545_v32 }
 0x34a   :  { %v547_v34 = vrot.slane %v546_v33, 1 }
 0x34c   :  { %v548_v35 = vmax.f32 %v546_v33, %v547_v34 }
 0x34e   :  { %v549_v36 = vsub.f32 %v538_v27, %v548_v35 }
 0x350   :  { %v550_v37 = vmul.f32 1.442695, %v549_v36 }
 0x352   :  { %682 = vpow2.f32 %v550_v37 }
 0x35f   :  { %v683_v38 = vpop.eup %682 }
 0x360   :  { %v552_v39 = vsel %vm541_vm6, %v683_v38, 0.0 }
 0x361   :  { %v553_v40 = vrot.slane %v552_v39, 4 }
 0x363   :  { %v554_v41 = vadd.f32 %v553_v40, %v552_v39 }
 0x365   :  { %v555_v42 = vrot.slane %v554_v41, 2 }
 0x367   :  { %v556_v43 = vadd.f32 %v555_v42, %v554_v41 }
 0x369   :  { %v557_v44 = vrot.slane %v556_v43, 1 }
 0x36b   :  { %v558_v45 = vadd.f32 %v557_v44, %v556_v43 }
 0x36d   :  { %684 = vrcp.f32 %v558_v45 }
 0x37a   :  { %v685_v46 = vpop.eup %684 }
 0x37b   :  { %v560_v47 = vmul.f32 %v685_v46, %v683_v38 }
 0x37d   :  { %561 = vst [vmem:[#allocation2] sm:$0x7] %v560_v47 }
 0x37e   :  { %697 = shalt.err (!%p694_p4)
}
 0x37f   :  { %571 = dma.vmem_to_hbm [thread:$0]  %s569_s7, 64, %s881_s9, [#allocation3]  }
 0x380   :  { %706 = dma.done.wait [#allocation3], 64  }
 0x381   :  { %707 = vsyncadd [#allocation3], 4294967232 }
 0x382   :  { %575 = vsyncpa [#allocation3], 1 }

</bundles_post_ra>
